<compile_context>
chip_gen: v5e
topology: v5e:2x2
jax: 0.10.0
libtpu: 0.0.40
codegen_flags: <defaults>
</compile_context>

<pallas_src>
import functools

import jax
import jax.numpy as jnp
from jax import lax
from jax.experimental import pallas as pl
from jax.experimental.pallas import tpu as pltpu

# AltMeanReturnLoss.__init__ defaults (module has no learned parameters).
ALPHA = 0.5                    # unused in forward (kept for fidelity)
EPSILON = 1e-8
WEIGHT_PENALTY_FACTOR = 1e-4   # unused in forward
MIN_TURNOVER = 0.05
TURNOVER_WEIGHT = 2.0
VOLATILITY_WEIGHT = 0.1


def _tile_kernel(p_ref, t_ref, sum_ref, ssc_ref, c_ref, to_ref, *, batch):
    """One (TB, N) batch tile -> four per-tile f32 scalar partials.

    sum_ref : sum over valid rows of the per-row portfolio return pr
    ssc_ref : sum over valid rows of (pr - c)^2, with c = tile mean of pr
    c_ref   : the tile-local center c (wrapper recombines exactly)
    to_ref  : within-tile turnover partial  sum_i sum_j |p[i] - p[i+1]|
    """
    tb, n = p_ref.shape
    base = pl.program_id(0) * tb

    p = p_ref[...].astype(jnp.float32)
    t = t_ref[...].astype(jnp.float32)

    if batch % tb != 0:
        # Last tile extends past the batch: rows read OOB contain garbage, so
        # zero them before any arithmetic (where() never propagates the garbage).
        rows = lax.broadcasted_iota(jnp.int32, (tb, n), 0) + base
        valid = rows < batch
        p = jnp.where(valid, p, 0.0)
        t = jnp.where(valid, t, 0.0)
        nk = jnp.minimum(batch - base, tb).astype(jnp.float32)   # valid rows here
    else:
        nk = jnp.float32(tb)

    # ---- per-row portfolio return --------------------------------------------
    # reference: weights = p / (|p|.sum(1,keepdim) + eps); pr = (weights*t).sum(1)
    # folded:    pr      = (p*t).sum(1) / (|p|.sum(1) + eps)
    # (the reference's where(weights_sum != 0) guard is dead: denom >= eps > 0)
    row_pt = jnp.sum(p * t, axis=1, keepdims=True)                    # (TB, 1)
    row_abs = jnp.sum(jnp.abs(p), axis=1, keepdims=True) + EPSILON    # (TB, 1)
    pr = row_pt / row_abs                                             # 0 on invalid rows

    sum_pr = jnp.sum(pr)
    c = sum_pr / nk
    # Invalid rows have pr == 0 exactly, so they contribute c^2 each to the
    # uncentered sum; subtract them instead of building a column mask.
    ssc = jnp.sum((pr - c) ** 2) - (jnp.float32(tb) - nk) * c * c

    # ---- within-tile turnover partial ----------------------------------------
    # sum_i |p[i] - p[i+1]| for consecutive rows inside this tile.  Adjacent
    # rows are brought together with an XLU sublane rotate; subtracting the wrap
    # term |p[TB-1] - p[0]| makes the result independent of the rotation
    # direction convention.  Zeroed (masked) rows make the |p[B-1] - 0| final
    # term fall out automatically when row B-1 is interior to the tile.
    if tb > 1:
        rolled = pltpu.roll(p, shift=tb - 1, axis=0)
        adj = jnp.sum(jnp.abs(p - rolled))
        wrap = jnp.sum(jnp.abs(p[tb - 1:tb, :] - p[0:1, :]))
        within = adj - wrap
    else:
        within = jnp.float32(0.0)

    sum_ref[...] = sum_pr.reshape(1, 1, 1)
    ssc_ref[...] = ssc.reshape(1, 1, 1)
    c_ref[...] = c.reshape(1, 1, 1)
    to_ref[...] = within.reshape(1, 1, 1)


def _vmem_capacity_bytes():
    try:
        return int(pltpu.get_tpu_info().vmem_capacity_bytes)
    except Exception:
        return 64 * 1024 * 1024   # v7x per-TensorCore VMEM: the safe lower bound


def _sublane_granule(itemsize):
    return {4: 8, 2: 16, 1: 32}.get(int(itemsize), 8)


def _choose_tile_rows(batch, num_assets, itemsize):
    """Largest batch tile that fits the generation's VMEM budget (>=2 tiles)."""
    sub = _sublane_granule(itemsize)
    if batch <= sub:
        return int(batch)                      # one full-array tile is always legal
    lanes = pl.cdiv(num_assets, 128) * 128     # lane-padded width resident in VMEM
    vmem = _vmem_capacity_bytes()
    # Per tile row: 2 inputs x 2 pipeline buffers (input dtype) + ~5 tile-sized
    # f32 temporaries (f32 upcasts of p/t, products/abs, roll, mask).
    per_row = lanes * (2 * 2 * int(itemsize) + 5 * 4)
    budget = min(int(vmem * 0.55), 56 * 1024 * 1024)
    cap = max(sub, budget // per_row)
    # At least 2 tiles so the "parallel" grid axis shards across v7x's 2 TCs
    # (one extra ~0.35us grid step is noise on the single-core v5e/v6e).
    two_tiles = pl.cdiv(pl.cdiv(batch, 2), sub) * sub
    tb = min(int(cap), int(two_tiles), int(batch))
    if tb >= 1024:
        tb = (tb // 128) * 128                 # keep the grid short / lane friendly
    tb = max(sub, (tb // sub) * sub)
    return int(tb)


def alt_mean_return_loss(predictions, targets, *, tile_rows=None):
    """Pallas TPU implementation of AltMeanReturnLoss.forward.

    predictions, targets: (batch, num_assets) arrays (f32 or bf16).
    Returns (loss, mean_weighted_return, turnover_penalty, volatility_penalty)
    as f32 scalars.
    """
    assert predictions.shape == targets.shape and predictions.ndim == 2
    B, N = predictions.shape
    itemsize = predictions.dtype.itemsize
    sub = _sublane_granule(itemsize)

    if tile_rows is None:
        TB = _choose_tile_rows(B, N, itemsize)
    else:
        TB = int(tile_rows)
        assert TB == B or (TB % sub == 0 and 0 < TB <= B), (
            "tile_rows must equal batch or be a positive multiple of the "
            f"sublane granule ({sub}) and <= batch")
    nt = pl.cdiv(B, TB)

    vmem = _vmem_capacity_bytes()
    vmem_limit = max(32 * 1024 * 1024, min(int(vmem * 0.75), 100 * 1024 * 1024))

    kernel = functools.partial(_tile_kernel, batch=B)
    tile_out_spec = lambda: pl.BlockSpec((1, 1, 1), lambda i: (i, 0, 0))
    tile_out_shape = jax.ShapeDtypeStruct((nt, 1, 1), jnp.float32)

    sums, sscs, cs, tos = pl.pallas_call(
        kernel,
        grid=(nt,),
        in_specs=[
            pl.BlockSpec((TB, N), lambda i: (i, 0)),
            pl.BlockSpec((TB, N), lambda i: (i, 0)),
        ],
        out_specs=(tile_out_spec(), tile_out_spec(), tile_out_spec(), tile_out_spec()),
        out_shape=(tile_out_shape, tile_out_shape, tile_out_shape, tile_out_shape),
        compiler_params=pltpu.CompilerParams(
            dimension_semantics=("parallel",),
            vmem_limit_bytes=vmem_limit),
    )(predictions, targets)

    # ---- tiny scalar epilogue (O(num_tiles) work, plain XLA) ------------------
    sum_k = sums[:, 0, 0]
    ssc_k = sscs[:, 0, 0]
    c_k = cs[:, 0, 0]
    counts = jnp.asarray([min(TB, B - k * TB) for k in range(nt)], dtype=jnp.float32)

    # exact mean of the per-row portfolio returns
    mean_weighted_return = jnp.sum(sum_k) / B

    # exact centered variance via the shift identity (robust: each tile's sum of
    # squares was centered in-kernel around its own tile mean c_k):
    #   sum_tile (x - mu)^2 = ssc_k - 2 d (sum_k - n_k c_k) + n_k d^2,  d = mu - c_k
    d = mean_weighted_return - c_k
    ss_total = jnp.sum(ssc_k - 2.0 * d * (sum_k - counts * c_k) + counts * d * d)
    volatility = jnp.sqrt(ss_total / B + EPSILON)
    volatility_penalty = volatility * VOLATILITY_WEIGHT

    # turnover: within-tile partials from the kernel + cross-tile boundary rows
    # |p[k*TB - 1] - p[k*TB]| (only 2*(nt-1) rows are touched; no full-array
    # copy / astype).  The final |p[B-1] - 0| term was captured in-kernel unless
    # row B-1 is the last row of its tile.
    within_sum = jnp.sum(tos)
    boundary = jnp.float32(0.0)
    if nt > 1:
        tails = predictions[TB - 1:(nt - 1) * TB:TB].astype(jnp.float32)
        heads = predictions[TB:(nt - 1) * TB + 1:TB].astype(jnp.float32)
        boundary = boundary + jnp.sum(jnp.abs(tails - heads))
    if B == nt * TB:
        boundary = boundary + jnp.sum(jnp.abs(predictions[B - 1].astype(jnp.float32)))
    turnover_value = (within_sum + boundary) / B
    turnover_penalty = jnp.exp(-TURNOVER_WEIGHT * (turnover_value - MIN_TURNOVER))

    loss = -mean_weighted_return + turnover_penalty + volatility_penalty
    return loss, mean_weighted_return, turnover_penalty, volatility_penalty


def alt_mean_return_loss_ref(predictions, targets):
    """Pure-JAX reference mirroring the PyTorch forward exactly."""
    p = predictions.astype(jnp.float32)
    t = targets.astype(jnp.float32)
    weights_sum = jnp.abs(p).sum(axis=1, keepdims=True) + EPSILON
    weights = jnp.where(weights_sum != 0, p / weights_sum, jnp.zeros_like(p))
    weighted_returns = weights * t
    mean_weighted_return = weighted_returns.sum(axis=1).mean()
    p_shift = jnp.concatenate([p[1:], jnp.zeros((1, p.shape[1]), p.dtype)], axis=0)
    turnover_value = jnp.abs(p - p_shift).sum(axis=1).mean()
    turnover_penalty = jnp.exp(-TURNOVER_WEIGHT * (turnover_value - MIN_TURNOVER))
    portfolio_returns = weighted_returns.sum(axis=1)
    volatility = jnp.sqrt(
        ((portfolio_returns - portfolio_returns.mean()) ** 2).mean() + EPSILON)
    volatility_penalty = volatility * VOLATILITY_WEIGHT
    loss = -mean_weighted_return + turnover_penalty + volatility_penalty
    return loss, mean_weighted_return, turnover_penalty, volatility_penalty


if __name__ == "__main__":
    key = jax.random.PRNGKey(0)

    configs = [
        # (batch, num_assets, tile_rows override, dtype)
        (16, 32, None, jnp.float32),   # default tiling -> 2 tiles, exact cover
        (24, 48, 8, jnp.float32),      # 3 tiles -> cross-tile turnover boundaries
        (13, 32, 8, jnp.float32),      # batch % tile != 0 -> in-kernel row masking
        (24, 48, None, jnp.bfloat16),  # bf16 streaming path (sublane granule 16)
    ]
    for idx, (B, N, tb, dt) in enumerate(configs):
        k1, k2 = jax.random.split(jax.random.fold_in(key, idx))
        predictions = jax.random.normal(k1, (B, N), dtype=dt)
        targets = (0.01 * jax.random.normal(k2, (B, N))).astype(dt)

        out = jax.block_until_ready(
            alt_mean_return_loss(predictions, targets, tile_rows=tb))
        ref = alt_mean_return_loss_ref(predictions, targets)

        for got, want in zip(out, ref):
            assert jnp.isfinite(got), (idx, got)
            assert jnp.allclose(got, want, rtol=1e-4, atol=1e-6), (idx, got, want)

    print("KERNEL_OK")
</pallas_src>

<mosaic_0001>
module attributes {stable_mosaic.version = 11 : i64} {
  func.func @_tile_kernel(%arg0: i32, %arg1: memref<8x32xf32, #tpu.memory_space<vmem>>, %arg2: memref<8x32xf32, #tpu.memory_space<vmem>>, %arg3: memref<1x1x1xf32, #tpu.memory_space<vmem>>, %arg4: memref<1x1x1xf32, #tpu.memory_space<vmem>>, %arg5: memref<1x1x1xf32, #tpu.memory_space<vmem>>, %arg6: memref<1x1x1xf32, #tpu.memory_space<vmem>>) attributes {dimension_semantics = [#tpu.dimension_semantics<parallel>], iteration_bounds = array<i64: 2>, scalar_prefetch = 0 : i64, scratch_operands = 0 : i64, tpu.core_type = #tpu.core_type<tc>, window_params = [{transform_indices = @transform_0, window_bounds = array<i64: 8, 32>}, {transform_indices = @transform_1, window_bounds = array<i64: 8, 32>}, {transform_indices = @transform_2, window_bounds = array<i64: 1, 1, 1>}, {transform_indices = @transform_3, window_bounds = array<i64: 1, 1, 1>}, {transform_indices = @transform_4, window_bounds = array<i64: 1, 1, 1>}, {transform_indices = @transform_5, window_bounds = array<i64: 1, 1, 1>}]} {
    %c0 = arith.constant 0 : index
    %c0_0 = arith.constant 0 : index
    %0 = vector.load %arg1[%c0, %c0_0] : memref<8x32xf32, #tpu.memory_space<vmem>>, vector<8x32xf32>
    %c0_1 = arith.constant 0 : index
    %c0_2 = arith.constant 0 : index
    %1 = vector.load %arg2[%c0_1, %c0_2] : memref<8x32xf32, #tpu.memory_space<vmem>>, vector<8x32xf32>
    %2 = arith.mulf %0, %1 : vector<8x32xf32>
    %cst = arith.constant dense<0.000000e+00> : vector<8xf32>
    %3 = vector.multi_reduction <add>, %2, %cst [1] : vector<8x32xf32> to vector<8xf32>
    %4 = vector.shape_cast %3 : vector<8xf32> to vector<8x1xf32>
    %5 = math.absf %0 : vector<8x32xf32>
    %cst_3 = arith.constant dense<0.000000e+00> : vector<8xf32>
    %6 = vector.multi_reduction <add>, %5, %cst_3 [1] : vector<8x32xf32> to vector<8xf32>
    %7 = vector.shape_cast %6 : vector<8xf32> to vector<8x1xf32>
    %cst_4 = arith.constant 9.99999993E-9 : f32
    %8 = vector.broadcast %cst_4 : f32 to vector<8x1xf32>
    %9 = arith.addf %7, %8 : vector<8x1xf32>
    %10 = arith.divf %4, %9 : vector<8x1xf32>
    %11 = vector.shape_cast %10 : vector<8x1xf32> to vector<1x8x1xf32>
    %cst_5 = arith.constant dense<0.000000e+00> : vector<1xf32>
    %12 = vector.multi_reduction <add>, %11, %cst_5 [1, 2] : vector<1x8x1xf32> to vector<1xf32>
    %13 = vector.shape_cast %12 : vector<1xf32> to vector<1x1x1xf32>
    %14 = vector.extract %13[0, 0, 0] : f32 from vector<1x1x1xf32>
    %cst_6 = arith.constant 8.000000e+00 : f32
    %15 = arith.divf %14, %cst_6 : f32
    %16 = vector.broadcast %15 : f32 to vector<8x1xf32>
    %17 = arith.subf %10, %16 : vector<8x1xf32>
    %18 = arith.mulf %17, %17 : vector<8x1xf32>
    %19 = vector.shape_cast %18 : vector<8x1xf32> to vector<1x8x1xf32>
    %cst_7 = arith.constant dense<0.000000e+00> : vector<1xf32>
    %20 = vector.multi_reduction <add>, %19, %cst_7 [1, 2] : vector<1x8x1xf32> to vector<1xf32>
    %21 = vector.shape_cast %20 : vector<1xf32> to vector<1x1x1xf32>
    %22 = vector.extract %21[0, 0, 0] : f32 from vector<1x1x1xf32>
    %cst_8 = arith.constant 8.000000e+00 : f32
    %cst_9 = arith.constant 8.000000e+00 : f32
    %23 = arith.subf %cst_8, %cst_9 : f32
    %24 = arith.mulf %23, %15 : f32
    %25 = arith.mulf %24, %15 : f32
    %26 = arith.subf %22, %25 : f32
    %c7_i32 = arith.constant 7 : i32
    %27 = tpu.dynamic_rotate %0 by %c7_i32 dim 0 : vector<8x32xf32>, i32 -> vector<8x32xf32>
    %28 = arith.subf %0, %27 : vector<8x32xf32>
    %29 = math.absf %28 : vector<8x32xf32>
    %30 = vector.shape_cast %29 : vector<8x32xf32> to vector<1x8x32xf32>
    %cst_10 = arith.constant dense<0.000000e+00> : vector<1xf32>
    %31 = vector.multi_reduction <add>, %30, %cst_10 [1, 2] : vector<1x8x32xf32> to vector<1xf32>
    %32 = vector.shape_cast %31 : vector<1xf32> to vector<1x1x1xf32>
    %33 = vector.extract %32[0, 0, 0] : f32 from vector<1x1x1xf32>
    %34 = vector.extract_strided_slice %0 {offsets = [7, 0], sizes = [1, 32], strides = [1, 1]} : vector<8x32xf32> to vector<1x32xf32>
    %35 = vector.extract_strided_slice %0 {offsets = [0, 0], sizes = [1, 32], strides = [1, 1]} : vector<8x32xf32> to vector<1x32xf32>
    %36 = arith.subf %34, %35 : vector<1x32xf32>
    %37 = math.absf %36 : vector<1x32xf32>
    %38 = vector.shape_cast %37 : vector<1x32xf32> to vector<1x1x32xf32>
    %cst_11 = arith.constant dense<0.000000e+00> : vector<1xf32>
    %39 = vector.multi_reduction <add>, %38, %cst_11 [1, 2] : vector<1x1x32xf32> to vector<1xf32>
    %40 = vector.shape_cast %39 : vector<1xf32> to vector<1x1x1xf32>
    %41 = vector.extract %40[0, 0, 0] : f32 from vector<1x1x1xf32>
    %42 = arith.subf %33, %41 : f32
    %43 = vector.broadcast %14 : f32 to vector<1x1x1xf32>
    %c0_12 = arith.constant 0 : index
    %c0_13 = arith.constant 0 : index
    %c0_14 = arith.constant 0 : index
    %44 = vector.load %arg3[%c0_12, %c0_13, %c0_14] : memref<1x1x1xf32, #tpu.memory_space<vmem>>, vector<1x1x1xf32>
    tpu.vector_store %arg3[%c0_12, %c0_13, %c0_14], %43 {strides = array<i32>} : memref<1x1x1xf32, #tpu.memory_space<vmem>>, vector<1x1x1xf32>,
    %45 = vector.broadcast %26 : f32 to vector<1x1x1xf32>
    %c0_15 = arith.constant 0 : index
    %c0_16 = arith.constant 0 : index
    %c0_17 = arith.constant 0 : index
    %46 = vector.load %arg4[%c0_15, %c0_16, %c0_17] : memref<1x1x1xf32, #tpu.memory_space<vmem>>, vector<1x1x1xf32>
    tpu.vector_store %arg4[%c0_15, %c0_16, %c0_17], %45 {strides = array<i32>} : memref<1x1x1xf32, #tpu.memory_space<vmem>>, vector<1x1x1xf32>,
    %47 = vector.broadcast %15 : f32 to vector<1x1x1xf32>
    %c0_18 = arith.constant 0 : index
    %c0_19 = arith.constant 0 : index
    %c0_20 = arith.constant 0 : index
    %48 = vector.load %arg5[%c0_18, %c0_19, %c0_20] : memref<1x1x1xf32, #tpu.memory_space<vmem>>, vector<1x1x1xf32>
    tpu.vector_store %arg5[%c0_18, %c0_19, %c0_20], %47 {strides = array<i32>} : memref<1x1x1xf32, #tpu.memory_space<vmem>>, vector<1x1x1xf32>,
    %49 = vector.broadcast %42 : f32 to vector<1x1x1xf32>
    %c0_21 = arith.constant 0 : index
    %c0_22 = arith.constant 0 : index
    %c0_23 = arith.constant 0 : index
    %50 = vector.load %arg6[%c0_21, %c0_22, %c0_23] : memref<1x1x1xf32, #tpu.memory_space<vmem>>, vector<1x1x1xf32>
    tpu.vector_store %arg6[%c0_21, %c0_22, %c0_23], %49 {strides = array<i32>} : memref<1x1x1xf32, #tpu.memory_space<vmem>>, vector<1x1x1xf32>,
    return
  }
  func.func @transform_0(%arg0: i32) -> (i32, i32) {
    %c0_i32 = arith.constant 0 : i32
    %c0_i32_0 = arith.constant 0 : i32
    return %arg0, %c0_i32 : i32, i32
  }
  func.func @transform_1(%arg0: i32) -> (i32, i32) {
    %c0_i32 = arith.constant 0 : i32
    %c0_i32_0 = arith.constant 0 : i32
    return %arg0, %c0_i32 : i32, i32
  }
  func.func @transform_2(%arg0: i32) -> (i32, i32, i32) {
    %c0_i32 = arith.constant 0 : i32
    %c0_i32_0 = arith.constant 0 : i32
    %c0_i32_1 = arith.constant 0 : i32
    return %arg0, %c0_i32, %c0_i32_0 : i32, i32, i32
  }
  func.func @transform_3(%arg0: i32) -> (i32, i32, i32) {
    %c0_i32 = arith.constant 0 : i32
    %c0_i32_0 = arith.constant 0 : i32
    %c0_i32_1 = arith.constant 0 : i32
    return %arg0, %c0_i32, %c0_i32_0 : i32, i32, i32
  }
  func.func @transform_4(%arg0: i32) -> (i32, i32, i32) {
    %c0_i32 = arith.constant 0 : i32
    %c0_i32_0 = arith.constant 0 : i32
    %c0_i32_1 = arith.constant 0 : i32
    return %arg0, %c0_i32, %c0_i32_0 : i32, i32, i32
  }
  func.func @transform_5(%arg0: i32) -> (i32, i32, i32) {
    %c0_i32 = arith.constant 0 : i32
    %c0_i32_0 = arith.constant 0 : i32
    %c0_i32_1 = arith.constant 0 : i32
    return %arg0, %c0_i32, %c0_i32_0 : i32, i32, i32
  }
}

</mosaic_0001>

<bundles_post_ra>
// kernel: tpu_custom_call.1
= control target key start
LH: loop header
LB: loop body
LE: loop exit
PB: predicated region body
PF: predicated region fallthrough
CT: control target
= control target key end

     0   :  { %11 = vsyncpa [#allocation3], 0  ;;  %s922_s0 = inlined_call_operand.hbm [shape: f32[16,32], index: 0, kind: input, shape index: {}]   ;;  %s923_s1 = inlined_call_operand.hbm [shape: f32[16,32], index: 1, kind: input, shape index: {}]   ;;  %s924_s2 = inlined_call_operand.vmem [shape: f32[2,1,1], index: 2, kind: output, shape index: {0}]   ;;  %s925_s3 = inlined_call_operand.vmem [shape: f32[2,1,1], index: 3, kind: output, shape index: {1}]   ;;  %s926_s4 = inlined_call_operand.vmem [shape: f32[2,1,1], index: 4, kind: output, shape index: {2}]   ;;  %s927_s5 = inlined_call_operand.vmem [shape: f32[2,1,1], index: 5, kind: output, shape index: {3}]  }
   0x1   :  { %13 = vsyncpa [#allocation3 + $0x1], 0 }
   0x2   :  { %14 = vsyncpa [#allocation5], 0 }
   0x3   :  { %16 = vsyncpa [#allocation5 + $0x1], 0  ;;  %s767_s18 = smov 0   ;;  %s769_s19 = smov 0  }
   0x4   :  { %s771_s20 = smov 0   ;;  %s773_s21 = smov 0  }
   0x5 LB: > { %s786_s22 = sadd.s32 4294967295, %s734_s21   ;;  %s789_s23 = sadd.s32 1, %s734_s21   ;;  %s734_s21 = sphi %s773_s21, %s935_s21   ;;  %s730_s20 = sphi %s771_s20, %s934_s20   ;;  %s726_s19 = sphi %s769_s19, %s933_s19   ;;  %s722_s18 = sphi %s767_s18, %s932_s18  }
   0x6   : > { %s26_s24 = ssub.s32 %s734_s21, %s789_s23  ;;  %s29_s25 = sadd.s32 1, %s730_s20 }
   0x7   : > { %p27_p0 = scmp.eq.s32.totalorder %s26_s24, 0  ;;  %p36_p1 = scmp.ne.s32.totalorder %s730_s20, %s726_s19 }
   0x8   : > { %p37_p2 = scmp.eq.s32.totalorder %s734_s21, 0  ;;  %p42_p3 = scmp.ne.s32.totalorder %s726_s19, %s722_s18 }
   0x9   : > { %s799_s26 = scalar_select %p27_p0, %s730_s20, %s29_s25  }
   0xa   : > { %p801_p4 = por %p37_p2, %p36_p1  ;;  %p43_p5 = scmp.eq.s32.totalorder %s786_s22, 0 }
   0xb   : > { %p598_p6 = scmp.lt.s32.totalorder %s734_s21, 2  ;;  %s812_s29 = sand.u32 1, %s730_s20  }
   0xc   : > { %p807_p7 = por %p43_p5, %p42_p3  ;;  %s568_s30 = sshll.u32 %s812_s29, 3 }
   0xd   : > { %s569_s6 = sshll.u32 %s734_s21, 3  ;;  %s200_s10 = scalar_lea.vmem [#allocation2], %s568_s30 }
   0xe   : > { %s204_s9 = scalar_lea.hbm %s922_s0, %s569_s6  ;;  %s208_s11 = sshll.u32 %s200_s10, 4  ;;  %s209_s11 = int_to_ptr.vmem [resolvable:$true] %s208_s11 }
   0xf   : > { %s206_s12 = sshll.u32 %s204_s9, 4  ;;  %p821_p8 = pnand %p598_p6, %p801_p4  ;;  %s207_s12 = int_to_ptr.hbm [resolvable:$true] %s206_s12 }
  0x10   : > { %p572_p9 = scmp.ge.s32.totalorder %s734_s21, 1  ;;  %p232_p10 = scmp.lt.s32.totalorder %s734_s21, 3 }
  0x11   : > { %s197_s14 = scalar_lea.sflag [#allocation3], %s812_s29  ;;  %s636_s15 = sshra.s32 %s207_s12, 4  ;;  %s637_s15 = int_to_ptr.hbm [resolvable:$true] %s636_s15 }
  0x12   : > { %s638_s16 = scalar_lea.hbm %s637_s15, 8  ;;  %p640_p12 = pneg %p821_p8 }
  0x13   : > { %p639_p11 = scmp.ne.s32.totalorder %s637_s15, %s638_s16  ;;  %s643_s24 = scalar_lea.hbm %s922_s0, 16 }
  0x14   : > { %p644_p1 = scmp.lt.s32.totalorder %s637_s15, %s922_s0  ;;  %p645_p2 = scmp.lt.s32.totalorder %s643_s24, %s638_s16 }
  0x15   : > { %p641_p13 = pnand %p640_p12, %p639_p11 }
  0x16   : > { %p646_p3 = por %p645_p2, %p644_p1 }
  0x17   : > { %p642_p0 = pneg %p641_p13 }
  0x19   : > { %p647_p4 = pnand %p646_p3, %p642_p0 }
  0x1b   : > { %650 = shalt.err (!%p647_p4)
}
  0x1c   : > { %594 = dma.hbm_to_vmem [thread:$0]  (!%p821_p8), %s207_s12, 128, %s209_s11, %s197_s14  }
  0x1d   : > { %p845_p5 = pnand %p572_p9, %p232_p10  ;;  %s223_s10 = scalar_lea.hbm %s923_s1, %s569_s6 }
  0x1e   : > { %s219_s15 = scalar_lea.vmem [#allocation4], %s568_s30  ;;  %s225_s17 = sshll.u32 %s223_s10, 4  ;;  %s226_s17 = int_to_ptr.hbm [resolvable:$true] %s225_s17 }
  0x1f   : > { %s227_s16 = sshll.u32 %s219_s15, 4  ;;  %s216_s18 = scalar_lea.sflag [#allocation5], %s812_s29  ;;  %s228_s16 = int_to_ptr.vmem [resolvable:$true] %s227_s16 }
  0x20   : > { %s666_s24 = sshra.s32 %s226_s17, 4  ;;  %s673_s12 = scalar_lea.hbm %s923_s1, 16  ;;  %s667_s24 = int_to_ptr.hbm [resolvable:$true] %s666_s24 }
  0x21   : > { %s668_s25 = scalar_lea.hbm %s667_s24, 8  ;;  %p674_p11 = scmp.lt.s32.totalorder %s667_s24, %s923_s1 }
  0x22   : > { %p669_p6 = scmp.ne.s32.totalorder %s667_s24, %s668_s25  ;;  %p675_p13 = scmp.lt.s32.totalorder %s673_s12, %s668_s25 }
  0x24   : > { %p671_p9 = pnand %p669_p6, %p640_p12  ;;  %p676_p0 = por %p675_p13, %p674_p11 }
  0x26   : > { %p672_p10 = pneg %p671_p9 }
  0x28   : > { %p677_p1 = pnand %p676_p0, %p672_p10 }
  0x2a   : > { %680 = shalt.err (!%p677_p1)
}
  0x2b   : > { %597 = dma.hbm_to_vmem [thread:$0]  (!%p821_p8), %s226_s17, 128, %s228_s16, %s216_s18  }
  0x2c   : > { %236 = sbr.rel (%p845_p5) target bundleno = 565 (0x235), region = 28  ;;  %s238_s29 = sand.u32 (!%p845_p5), 1, %s726_s19  }
  0x2d   : > { %s573_s30 = sshll.u32 (!%p845_p5), %s238_s29, 3  ;;  %s239_s27 = scalar_lea.sflag (!%p845_p5), [#allocation3], %s238_s29 }
  0x2e   : > { %s242_s8 = scalar_lea.vmem (!%p845_p5), [#allocation2], %s573_s30 }
  0x31   : > { %713 = dma.done.wait (%p807_p7), %s239_s27, 128  }
  0x32   : > { %715 = vsyncadd (%p807_p7), %s239_s27, 4294967168  ;;  %s249_s9 = scalar_lea.sflag [#allocation5], %s238_s29  ;;  %s252_s10 = scalar_lea.vmem [#allocation4], %s573_s30 }
  0x33   : > { %717 = dma.done.wait (%p807_p7), %s249_s9, 128  }
  0x34   : > { %719 = vsyncadd (%p807_p7), %s249_s9, 4294967168  ;;  %v304_v0 = vld [vmem:[%s242_s8] sm:$0xff]  ;;  %vm307_vm0 = vcmask 261120   ;;  %v305_v2 = vld [vmem:[%s252_s10] sm:$0xff]  ;;  %vm331_vm5 = vcmask 7168   ;;  %v736_v23 = vmov 8.0  }
  0x35   : > { %v311_v1 = vand.u32 2147483647, %v304_v0  ;;  %v306_v4 = vmul.f32 %v305_v2, %v304_v0  ;;  %v367_v21 = vrot.slane %v304_v0, 1  ;;  %vm388_vm7 = vcmask 253952   ;;  %p292_p7 = scmp.lt.s32.totalorder %s786_s22, 1 }
  0x36   : > { %vm401_vm8 = vcmask 0  }
  0x37   : > { %v312_v3 = vsel %vm307_vm0, %v311_v1, 0.0  ;;  %v308_v5 = vsel %vm307_vm0, %v306_v4, 0.0  ;;  %v368_v22 = vsub.f32 %v304_v0, %v367_v21  ;;  %s937_s22 = smov (!%p292_p7, %s786_s22), 1 }
  0x38   : > { %313 = vadd.xlane.f32.xlu0 %v312_v3  ;;  %s294_s7 = scalar_lea.vmem %s924_s2, %s937_s22  ;;  %s300_s25 = scalar_lea.vmem %s926_s4, %s937_s22 }
  0x39   : > { %v369_v24 = vand.u32 2147483647, %v368_v22  ;;  %s297_s6 = scalar_lea.vmem %s925_s3, %s937_s22  ;;  %s303_s28 = scalar_lea.vmem %s927_s5, %s937_s22 }
  0x3b   : > { %v370_v25 = vsel %vm307_vm0, %v369_v24, 0.0  ;;  %v386_v39 = vrot.slane %v369_v24, 7 }
  0x3c   : > { %371 = vadd.xlane.f32.xlu2 %v370_v25 }
  0x3d   : > { %v389_v40 = vsel %vm388_vm7, %v386_v39, 0.0 }
  0x40   : > { %309 = vadd.xlane.f32.xlu0 %v308_v5 }
  0x44   : > { %390 = vadd.xlane.f32.xlu2 %v389_v40 }
  0xab   : > { %v314_v6 = vpop.xlane.xlu0 %313 }
  0xac   : > { %v315_v7 = vadd.f32 1e-08, %v314_v6 }
  0xae   : > { %632 = vrcp.f32 %v315_v7  ;;  %v327_v11 = vand.u32 2147483648, %v315_v7  ;;  %v325_v13 = vand.u32 2147483647, %v315_v7  ;;  %vm321_vm2 = vweird.f32 %v315_v7 }
  0xaf   : > { %634 = vrcp.f32 %v736_v23  ;;  %v372_v46 = vpop.xlane.xlu2 %371 }
  0xb0   : > { %v328_v15 = vor.u32 1.1754944e-38, %v327_v11  ;;  %vm326_vm4 = vcmp.eq.f32.partialorder %v325_v13, 8.507059e+37  ;;  %v373_v48 = vrot.slane %v372_v46, 4 }
  0xb2   : > { %v374_v50 = vadd.f32 %v373_v48, %v372_v46 }
  0xb3   : > { %v310_v16 = vpop.xlane.xlu0 %309 }
  0xb4   : > { %v633_v8 = vpop.eup %632  ;;  %v375_v52 = vrot.slane %v374_v50, 2 }
  0xb5   : > { %v317_v9 = vmul.f32 %v633_v8, %v315_v7  ;;  %vm322_vm1 = vweird.f32 %v633_v8  ;;  %v635_v26 = vpop.eup %634 }
  0xb6   : > { %vm323_vm3 = vmor %vm321_vm2, %vm322_vm1  ;;  %v343_v27 = vmul.f32 8.0, %v635_v26  ;;  %vm347_vm6 = vweird.f32 %v635_v26  ;;  %v376_v57 = vadd.f32 %v375_v52, %v374_v50 }
  0xb7   : > { %v318_v10 = vsub.f32 1.0, %v317_v9  ;;  %v391_v47 = vpop.xlane.xlu2 %390 }
  0xb8   : > { %v344_v28 = vsub.f32 1.0, %v343_v27  ;;  %v392_v49 = vrot.slane %v391_v47, 4  ;;  %v377_v61 = vrot.slane %v376_v57, 1 }
  0xb9   : > { %v319_v12 = vmul.f32 %v633_v8, %v318_v10 }
  0xba   : > { %v345_v32 = vmul.f32 %v635_v26, %v344_v28  ;;  %v393_v51 = vadd.f32 %v392_v49, %v391_v47  ;;  %v378_v1 = vadd.f32 %v377_v61, %v376_v57 }
  0xbb   : > { %v320_v14 = vadd.f32 %v633_v8, %v319_v12 }
  0xbc   : > { %v346_v35 = vadd.f32 %v635_v26, %v345_v32  ;;  %v394_v54 = vrot.slane %v393_v51, 2 }
  0xbd   : > { %v324_v17 = vsel %vm323_vm3, %v633_v8, %v320_v14 }
  0xbe   : > { %v329_v18 = vsel %vm326_vm4, %v328_v15, %v324_v17  ;;  %v348_v38 = vsel %vm347_vm6, %v635_v26, %v346_v35  ;;  %v395_v58 = vadd.f32 %v394_v54, %v393_v51 }
  0xbf   : > { %v330_v19 = vmul.f32 %v329_v18, %v310_v16 }
  0xc0   : > { %v396_v63 = vrot.slane %v395_v58, 1 }
  0xc1   : > { %v332_v20 = vsel %vm331_vm5, %v330_v19, 0.0 }
  0xc2   : > { %333 = vadd.xlane.f32.xlu1 %v332_v20  ;;  %v397_v2 = vadd.f32 %v396_v63, %v395_v58 }
 0x135   : > { %v334_v29 = vpop.xlane.xlu1 %333 }
 0x136   : > { %v335_v30 = vrot.slane %v334_v29, 4 }
 0x138   : > { %v336_v31 = vadd.f32 %v335_v30, %v334_v29 }
 0x13a   : > { %v337_v33 = vrot.slane %v336_v31, 2 }
 0x13c   : > { %v338_v34 = vadd.f32 %v337_v33, %v336_v31 }
 0x13e   : > { %v339_v36 = vrot.slane %v338_v34, 1 }
 0x140   : > { %v340_v37 = vadd.f32 %v339_v36, %v338_v34 }
 0x142   : > { %577 = vpush %v340_v37 }
 0x143   : > { %579 = vpush %v348_v38 }
 0x173   : > { %s578_s15 = spop %577 }
 0x174   : > { %v400_v41 = vstv %s578_s15  ;;  %s580_s16 = spop %579 }
 0x175   : > { %402 = vst.msk [vmem:[%s294_s7] sm:$0x1] %vm401_vm8, %v400_v41  ;;  %s888_s17 = smul.f32 %s580_s16, %s578_s15 }
 0x177   : > { %v351_v42 = vstv %s888_s17  ;;  %s364_s21 = smul.f32 0.0, %s888_s17 }
 0x178   : > { %v352_v43 = vsub.f32 %v330_v19, %v351_v42  ;;  %405 = vst.msk [vmem:[%s300_s25] sm:$0x1] %vm401_vm8, %v351_v42 }
 0x179   : > { %s365_s11 = smul.f32 %s364_s21, %s888_s17 }
 0x17a   : > { %v353_v44 = vmul.f32 %v352_v43, %v352_v43 }
 0x17c   : > { %v354_v45 = vsel %vm331_vm5, %v353_v44, 0.0 }
 0x17d   : > { %355 = vadd.xlane.f32.xlu1 %v354_v45 }
 0x1f0   : > { %v356_v53 = vpop.xlane.xlu1 %355 }
 0x1f1   : > { %v357_v55 = vrot.slane %v356_v53, 4 }
 0x1f3   : > { %v358_v56 = vadd.f32 %v357_v55, %v356_v53 }
 0x1f5   : > { %v359_v59 = vrot.slane %v358_v56, 2 }
 0x1f7   : > { %v360_v60 = vadd.f32 %v359_v59, %v358_v56 }
 0x1f9   : > { %v361_v62 = vrot.slane %v360_v60, 1 }
 0x1fb   : > { %v362_v0 = vadd.f32 %v361_v62, %v360_v60 }
 0x1fd   : > { %581 = vpush %v362_v0 }
 0x1fe   : > { %583 = vpush %v378_v1 }
 0x1ff   : > { %585 = vpush %v397_v2 }
 0x22e   : > { %s582_s29 = spop %581 }
 0x22f   : > { %s366_s30 = ssub.f32 %s582_s29, %s365_s11  ;;  %s584_s27 = spop %583 }
 0x230   : > { %s586_s8 = spop %585 }
 0x231   : > { %v403_v3 = vstv %s366_s30  ;;  %s399_s13 = ssub.f32 %s584_s27, %s586_s8 }
 0x232   : > { %404 = vst.msk [vmem:[%s297_s6] sm:$0x1] %vm401_vm8, %v403_v3 }
 0x233   : > { %v406_v4 = vstv %s399_s13 }
 0x234   : > { %407 = vst.msk [vmem:[%s303_s28] sm:$0x1] %vm401_vm8, %v406_v4 }
 0x235 PF: > { %p19_p8 = scmp.ge.s32.totalorder %s789_s23, 4   ;;  %s932_s18 = smov %s726_s19 }
 0x236   : > { %s933_s19 = smov %s730_s20  ;;  %s934_s20 = smov %s799_s26 }
 0x237   : > { %s935_s21 = smov %s789_s23  ;;  %21 = sbr.rel (!%p19_p8) target bundleno = 5 (0x5), region = 117 }
 0x23c   :  { %461 = vsyncpa [#allocation3], 1 }
 0x23d   :  { %463 = vsyncpa [#allocation3 + $0x1], 1 }
 0x23e   :  { %464 = vsyncpa [#allocation5], 1 }
 0x23f   :  { %466 = vsyncpa [#allocation5 + $0x1], 1 }

</bundles_post_ra>
